<compile_context>
chip_gen: v7x
topology: tpu7x:2x2x1
jax: 0.10.0
libtpu: 0.0.40
codegen_flags: <defaults>
</compile_context>

<pallas_src>
import functools

import jax
import jax.numpy as jnp
from jax import lax
from jax.experimental import pallas as pl
from jax.experimental.pallas import tpu as pltpu


def _reward_criterion_kernel(inp_ref, seq_ref, rew_ref, out_ref,
                             num_ref, den_ref, *, total_rows):
    pid = pl.program_id(0)

    @pl.when(pid == 0)
    def _init():
        num_ref[...] = jnp.zeros_like(num_ref)
        den_ref[...] = jnp.zeros_like(den_ref)

    # In-kernel upcast (inputs may arrive as bf16); rides the VPU, which has
    # huge slack in this HBM-bound kernel.
    inp = inp_ref[...].astype(jnp.float32)      # [TB, T]
    rew = rew_ref[...].astype(jnp.float32)      # [TB, T]
    seq = seq_ref[...]                          # [TB, T] integer token ids

    TB, T = inp.shape

    # Rows past the real batch size (last, partially-filled block) are invalid.
    row = lax.broadcasted_iota(jnp.int32, (TB, T), 0) + pid * TB
    row_valid = row < total_rows
    col = lax.broadcasted_iota(jnp.int32, (TB, T), 1)

    # mask[:, 0] = 1, mask[:, t] = (seq[:, t-1] > 0) for t >= 1.
    # pltpu.roll wraps within the block, but column 0 is overwritten anyway and
    # T is never tiled, so the wrapped value is always discarded.
    seq_mask = jnp.where(row_valid & (seq > 0), 1.0, 0.0).astype(jnp.float32)
    rolled = pltpu.roll(seq_mask, shift=1, axis=1)
    first_col = row_valid.astype(jnp.float32)
    mask = jnp.where(col == 0, first_col, rolled)

    # where() (instead of a bare multiply) also guards against garbage values
    # in the out-of-bounds padding rows of the last block.
    contrib = jnp.where(mask > 0.0, -inp * rew, 0.0)

    num_ref[...] += jnp.sum(contrib, keepdims=True)
    den_ref[...] += jnp.sum(mask, keepdims=True)

    @pl.when(pid == pl.num_programs(0) - 1)
    def _finalize():
        out_ref[...] = num_ref[...] / den_ref[...]


def reward_criterion(inp, seq, reward, *, block_rows=None,
                     vmem_budget_bytes=8 * 1024 * 1024):
    """input/reward: [B, T] float (f32 or bf16), seq: [B, T] int -> scalar f32."""
    B, T = inp.shape
    assert seq.shape == (B, T) and reward.shape == (B, T)

    if block_rows is None:
        # Double-buffered VMEM footprint: 2 buffers x 3 inputs x TB x T bytes.
        bytes_per_row = 2 * T * (jnp.dtype(inp.dtype).itemsize
                                 + jnp.dtype(seq.dtype).itemsize
                                 + jnp.dtype(reward.dtype).itemsize)
        block_rows = max(1, vmem_budget_bytes // max(bytes_per_row, 1))

    TB = int(min(block_rows, B))
    if TB < B:
        TB = (TB // 8) * 8          # sublane-aligned tiles when actually tiling
        if TB < 8:
            TB = B                  # tiny batch: single full block is always legal
    grid = (pl.cdiv(B, TB),)

    kernel = functools.partial(_reward_criterion_kernel, total_rows=B)

    out = pl.pallas_call(
        kernel,
        out_shape=jax.ShapeDtypeStruct((1, 1), jnp.float32),
        grid_spec=pltpu.PrefetchScalarGridSpec(
            num_scalar_prefetch=0,
            grid=grid,
            in_specs=[
                pl.BlockSpec((TB, T), lambda i: (i, 0)),
                pl.BlockSpec((TB, T), lambda i: (i, 0)),
                pl.BlockSpec((TB, T), lambda i: (i, 0)),
            ],
            out_specs=pl.BlockSpec((1, 1), lambda i: (0, 0)),
            scratch_shapes=[
                pltpu.VMEM((1, 1), jnp.float32),   # running numerator
                pltpu.VMEM((1, 1), jnp.float32),   # running denominator
            ],
        ),
        # Accumulator over the batch grid => reduction axis must be "arbitrary".
        # TODO(synk): v7x-only variant: emit per-block (num, den) partials with
        # dimension_semantics=("parallel",) to shard the stream over both TCs.
        compiler_params=pltpu.CompilerParams(
            dimension_semantics=("arbitrary",),
        ),
    )(inp, seq, reward)
    return out[0, 0]


def _reference(inp, seq, reward):
    # Pure-JAX reference mirroring the PyTorch module.
    inp = inp.astype(jnp.float32)
    reward = reward.astype(jnp.float32)
    mask = (seq > 0).astype(jnp.float32)
    mask = jnp.concatenate(
        [jnp.ones((mask.shape[0], 1), jnp.float32), mask[:, :-1]], axis=1)
    return jnp.sum(-inp * reward * mask) / jnp.sum(mask)


if __name__ == "__main__":
    key = jax.random.PRNGKey(0)
    k1, k2, k3, k4, k5, k6 = jax.random.split(key, 6)

    # --- small f32 case (matches the module's typical [batch, seq_len] use) ---
    B, T = 2, 8
    inp = -jnp.abs(jax.random.normal(k1, (B, T), dtype=jnp.float32))
    seq = jax.random.randint(k2, (B, T), minval=0, maxval=5, dtype=jnp.int32)
    reward = jax.random.normal(k3, (B, T), dtype=jnp.float32)

    out = reward_criterion(inp, seq, reward)
    jax.block_until_ready(out)
    ref = _reference(inp, seq, reward)
    assert jnp.allclose(out, ref, atol=1e-5, rtol=1e-5), (out, ref)

    # --- tiled + ragged-batch case (exercises grid, accumulator, row masking) ---
    B2, T2 = 20, 128
    inp2 = -jnp.abs(jax.random.normal(k4, (B2, T2), dtype=jnp.float32))
    seq2 = jax.random.randint(k5, (B2, T2), minval=0, maxval=5, dtype=jnp.int32)
    rew2 = jax.random.normal(k6, (B2, T2), dtype=jnp.float32)

    out2 = reward_criterion(inp2, seq2, rew2, block_rows=8)   # grid of 3 blocks
    jax.block_until_ready(out2)
    ref2 = _reference(inp2, seq2, rew2)
    assert jnp.allclose(out2, ref2, atol=1e-5, rtol=1e-5), (out2, ref2)

    # --- bf16 inputs: no wrapper-side upcast, cast happens inside the kernel ---
    out3 = reward_criterion(inp2.astype(jnp.bfloat16), seq2,
                            rew2.astype(jnp.bfloat16))
    jax.block_until_ready(out3)
    ref3 = _reference(inp2.astype(jnp.bfloat16), seq2, rew2.astype(jnp.bfloat16))
    assert jnp.allclose(out3, ref3, atol=1e-3, rtol=1e-3), (out3, ref3)

    print("KERNEL_OK")
</pallas_src>

<mosaic_0001>
module attributes {stable_mosaic.version = 11 : i64} {
  func.func @_reward_criterion_kernel(%arg0: i32, %arg1: memref<2x8xf32, #tpu.memory_space<vmem>>, %arg2: memref<2x8xi32, #tpu.memory_space<vmem>>, %arg3: memref<2x8xf32, #tpu.memory_space<vmem>>, %arg4: memref<1x1xf32, #tpu.memory_space<vmem>>, %arg5: memref<1x1xf32, #tpu.memory_space<vmem>>, %arg6: memref<1x1xf32, #tpu.memory_space<vmem>>) attributes {dimension_semantics = [#tpu.dimension_semantics<arbitrary>], iteration_bounds = array<i64: 1>, scalar_prefetch = 0 : i64, scratch_operands = 2 : i64, tpu.core_type = #tpu.core_type<tc>, window_params = [{transform_indices = @transform_0, window_bounds = array<i64: 2, 8>}, {transform_indices = @transform_1, window_bounds = array<i64: 2, 8>}, {transform_indices = @transform_2, window_bounds = array<i64: 2, 8>}, {pipeline_mode = #tpu.pipeline_mode<synchronous>, transform_indices = @transform_3, window_bounds = array<i64: 1, 1>}]} {
    %c0_i32 = arith.constant 0 : i32
    %0 = arith.cmpi eq, %arg0, %c0_i32 : i32
    %1 = arith.extui %0 : i1 to i32
    %c0_i32_0 = arith.constant 0 : i32
    %2 = arith.cmpi ne, %1, %c0_i32_0 : i32
    scf.if %2 {
      %cst_25 = arith.constant 0.000000e+00 : f32
      %51 = vector.broadcast %cst_25 : f32 to vector<1x1xf32>
      %c0_26 = arith.constant 0 : index
      %c0_27 = arith.constant 0 : index
      %52 = vector.load %arg5[%c0_26, %c0_27] : memref<1x1xf32, #tpu.memory_space<vmem>>, vector<1x1xf32>
      tpu.vector_store %arg5[%c0_26, %c0_27], %51 {strides = array<i32>} : memref<1x1xf32, #tpu.memory_space<vmem>>, vector<1x1xf32>,
      %cst_28 = arith.constant 0.000000e+00 : f32
      %53 = vector.broadcast %cst_28 : f32 to vector<1x1xf32>
      %c0_29 = arith.constant 0 : index
      %c0_30 = arith.constant 0 : index
      %54 = vector.load %arg6[%c0_29, %c0_30] : memref<1x1xf32, #tpu.memory_space<vmem>>, vector<1x1xf32>
      tpu.vector_store %arg6[%c0_29, %c0_30], %53 {strides = array<i32>} : memref<1x1xf32, #tpu.memory_space<vmem>>, vector<1x1xf32>,
    } else {
    }
    %c0 = arith.constant 0 : index
    %c0_1 = arith.constant 0 : index
    %3 = vector.load %arg1[%c0, %c0_1] : memref<2x8xf32, #tpu.memory_space<vmem>>, vector<2x8xf32>
    %c0_2 = arith.constant 0 : index
    %c0_3 = arith.constant 0 : index
    %4 = vector.load %arg3[%c0_2, %c0_3] : memref<2x8xf32, #tpu.memory_space<vmem>>, vector<2x8xf32>
    %c0_4 = arith.constant 0 : index
    %c0_5 = arith.constant 0 : index
    %5 = vector.load %arg2[%c0_4, %c0_5] : memref<2x8xi32, #tpu.memory_space<vmem>>, vector<2x8xi32>
    %6 = tpu.iota {dimensions = array<i32: 0>} : vector<2x8xi32>
    %c2_i32 = arith.constant 2 : i32
    %7 = arith.muli %arg0, %c2_i32 : i32
    %8 = vector.broadcast %7 : i32 to vector<2x8xi32>
    %9 = arith.addi %6, %8 : vector<2x8xi32>
    %c2_i32_6 = arith.constant 2 : i32
    %10 = vector.broadcast %c2_i32_6 : i32 to vector<2x8xi32>
    %11 = arith.cmpi slt, %9, %10 : vector<2x8xi32>
    %12 = tpu.iota {dimensions = array<i32: 1>} : vector<2x8xi32>
    %c0_i32_7 = arith.constant 0 : i32
    %13 = vector.broadcast %c0_i32_7 : i32 to vector<2x8xi32>
    %14 = arith.cmpi sgt, %5, %13 : vector<2x8xi32>
    %15 = arith.andi %11, %14 : vector<2x8xi1>
    %cst = arith.constant 1.000000e+00 : f32
    %cst_8 = arith.constant 0.000000e+00 : f32
    %16 = vector.broadcast %cst : f32 to vector<2x8xf32>
    %17 = vector.broadcast %cst_8 : f32 to vector<2x8xf32>
    %18 = arith.select %15, %16, %17 : vector<2x8xi1>, vector<2x8xf32>
    %c1_i32 = arith.constant 1 : i32
    %19 = tpu.dynamic_rotate %18 by %c1_i32 dim 1 : vector<2x8xf32>, i32 -> vector<2x8xf32>
    %20 = arith.extui %11 : vector<2x8xi1> to vector<2x8xi32>
    %21 = arith.sitofp %20 : vector<2x8xi32> to vector<2x8xf32>
    %c0_i32_9 = arith.constant 0 : i32
    %22 = vector.broadcast %c0_i32_9 : i32 to vector<2x8xi32>
    %23 = arith.cmpi eq, %12, %22 : vector<2x8xi32>
    %24 = arith.select %23, %21, %19 : vector<2x8xi1>, vector<2x8xf32>
    %cst_10 = arith.constant 0.000000e+00 : f32
    %25 = vector.broadcast %cst_10 : f32 to vector<2x8xf32>
    %26 = arith.cmpf ogt, %24, %25 : vector<2x8xf32>
    %cst_11 = arith.constant 0.000000e+00 : f32
    %27 = vector.broadcast %cst_11 : f32 to vector<2x8xf32>
    %28 = arith.subf %27, %3 : vector<2x8xf32>
    %29 = arith.mulf %28, %4 : vector<2x8xf32>
    %cst_12 = arith.constant 0.000000e+00 : f32
    %30 = vector.broadcast %cst_12 : f32 to vector<2x8xf32>
    %31 = arith.select %26, %29, %30 : vector<2x8xi1>, vector<2x8xf32>
    %c0_13 = arith.constant 0 : index
    %c0_14 = arith.constant 0 : index
    %32 = vector.load %arg5[%c0_13, %c0_14] : memref<1x1xf32, #tpu.memory_space<vmem>>, vector<1x1xf32>
    %33 = vector.shape_cast %31 : vector<2x8xf32> to vector<1x2x8xf32>
    %cst_15 = arith.constant dense<0.000000e+00> : vector<1xf32>
    %34 = vector.multi_reduction <add>, %33, %cst_15 [1, 2] : vector<1x2x8xf32> to vector<1xf32>
    %35 = vector.shape_cast %34 : vector<1xf32> to vector<1x1x1xf32>
    %36 = vector.extract %35[0, 0, 0] : f32 from vector<1x1x1xf32>
    %37 = vector.broadcast %36 : f32 to vector<1x1xf32>
    %38 = arith.addf %32, %37 : vector<1x1xf32>
    %c0_16 = arith.constant 0 : index
    %c0_17 = arith.constant 0 : index
    %39 = vector.load %arg5[%c0_16, %c0_17] : memref<1x1xf32, #tpu.memory_space<vmem>>, vector<1x1xf32>
    tpu.vector_store %arg5[%c0_16, %c0_17], %38 {strides = array<i32>} : memref<1x1xf32, #tpu.memory_space<vmem>>, vector<1x1xf32>,
    %c0_18 = arith.constant 0 : index
    %c0_19 = arith.constant 0 : index
    %40 = vector.load %arg6[%c0_18, %c0_19] : memref<1x1xf32, #tpu.memory_space<vmem>>, vector<1x1xf32>
    %41 = vector.shape_cast %24 : vector<2x8xf32> to vector<1x2x8xf32>
    %cst_20 = arith.constant dense<0.000000e+00> : vector<1xf32>
    %42 = vector.multi_reduction <add>, %41, %cst_20 [1, 2] : vector<1x2x8xf32> to vector<1xf32>
    %43 = vector.shape_cast %42 : vector<1xf32> to vector<1x1x1xf32>
    %44 = vector.extract %43[0, 0, 0] : f32 from vector<1x1x1xf32>
    %45 = vector.broadcast %44 : f32 to vector<1x1xf32>
    %46 = arith.addf %40, %45 : vector<1x1xf32>
    %c0_21 = arith.constant 0 : index
    %c0_22 = arith.constant 0 : index
    %47 = vector.load %arg6[%c0_21, %c0_22] : memref<1x1xf32, #tpu.memory_space<vmem>>, vector<1x1xf32>
    tpu.vector_store %arg6[%c0_21, %c0_22], %46 {strides = array<i32>} : memref<1x1xf32, #tpu.memory_space<vmem>>, vector<1x1xf32>,
    %c0_i32_23 = arith.constant 0 : i32
    %48 = arith.cmpi eq, %arg0, %c0_i32_23 : i32
    %49 = arith.extui %48 : i1 to i32
    %c0_i32_24 = arith.constant 0 : i32
    %50 = arith.cmpi ne, %49, %c0_i32_24 : i32
    scf.if %50 {
      %c0_25 = arith.constant 0 : index
      %c0_26 = arith.constant 0 : index
      %51 = vector.load %arg5[%c0_25, %c0_26] : memref<1x1xf32, #tpu.memory_space<vmem>>, vector<1x1xf32>
      %c0_27 = arith.constant 0 : index
      %c0_28 = arith.constant 0 : index
      %52 = vector.load %arg6[%c0_27, %c0_28] : memref<1x1xf32, #tpu.memory_space<vmem>>, vector<1x1xf32>
      %53 = arith.divf %51, %52 : vector<1x1xf32>
      %c0_29 = arith.constant 0 : index
      %c0_30 = arith.constant 0 : index
      %54 = vector.load %arg4[%c0_29, %c0_30] : memref<1x1xf32, #tpu.memory_space<vmem>>, vector<1x1xf32>
      tpu.vector_store %arg4[%c0_29, %c0_30], %53 {strides = array<i32>} : memref<1x1xf32, #tpu.memory_space<vmem>>, vector<1x1xf32>,
    } else {
    }
    return
  }
  func.func @transform_0(%arg0: i32) -> (i32, i32) {
    %c0_i32 = arith.constant 0 : i32
    %c0_i32_0 = arith.constant 0 : i32
    return %arg0, %c0_i32 : i32, i32
  }
  func.func @transform_1(%arg0: i32) -> (i32, i32) {
    %c0_i32 = arith.constant 0 : i32
    %c0_i32_0 = arith.constant 0 : i32
    return %arg0, %c0_i32 : i32, i32
  }
  func.func @transform_2(%arg0: i32) -> (i32, i32) {
    %c0_i32 = arith.constant 0 : i32
    %c0_i32_0 = arith.constant 0 : i32
    return %arg0, %c0_i32 : i32, i32
  }
  func.func @transform_3(%arg0: i32) -> (i32, i32) {
    %c0_i32 = arith.constant 0 : i32
    %c0_i32_0 = arith.constant 0 : i32
    %c0_i32_1 = arith.constant 0 : i32
    return %c0_i32, %c0_i32_0 : i32, i32
  }
}

</mosaic_0001>

<bundles_post_ra>
// kernel: tpu_custom_call.1
= control target key start
LH: loop header
LB: loop body
LE: loop exit
PB: predicated region body
PF: predicated region fallthrough
CT: control target
= control target key end

     0   :  { %8 = vsyncpa [#allocation5], 0  ;;  %s242_s0 = inlined_call_operand.hbm [shape: f32[2,8], index: 0, kind: input, shape index: {}]   ;;  %s243_s1 = inlined_call_operand.vmem [shape: s32[2,8], index: 1, kind: input, shape index: {}]   ;;  %s244_s2 = inlined_call_operand.vmem [shape: f32[2,8], index: 2, kind: input, shape index: {}]   ;;  %s245_s3 = inlined_call_operand.hbm [shape: f32[1,1], index: 3, kind: output, shape index: {}]  }
   0x1   :  { %9 = vsyncpa [#allocation6], 0  ;;  %s180_s12 = smov [#allocation4]   ;;  %s132_s16 = scalar_lea.hbm %s242_s0, 32 }
   0x2   :  { %s16_s13 = sshll.u32 %s180_s12, 4  ;;  %p133_p0 = scmp.ne.s32.totalorder %s242_s0, %s132_s16  ;;  %s17_s13 = int_to_ptr.vmem [resolvable:$true] %s16_s13 }
   0x3   :  { %p136_p1 = scmp.lt.u32.totalorder %s132_s16, %s242_s0 }
   0x5   :  { %p138_p2 = pnand %p136_p1, %p133_p0 }
   0x7   :  { %141 = shalt.err (!%p138_p2)
}
   0x8   :  { %s142_s21 = scalar_lea.vmem %s17_s13, 32  ;;  %p147_p4 = scmp.lt.s32.totalorder %s17_s13, %s17_s13 }
   0x9   :  { %p143_p3 = scmp.ne.s32.totalorder %s17_s13, %s142_s21  ;;  %p148_p5 = scmp.lt.s32.totalorder %s142_s21, %s142_s21 }
   0xb   :  { %p149_p6 = por %p148_p5, %p147_p4 }
   0xd   :  { %p150_p7 = pnand %p149_p6, %p143_p3 }
   0xf   :  { %153 = shalt.err (!%p150_p7)
}
  0x10   :  { %19 = dma.hbm_to_vmem [thread:$0]  %s242_s0, 32, %s17_s13, [#allocation5]  }
  0x11   :  { %176 = dma.done.wait [#allocation5], 32  }
  0x12   :  { %177 = vsyncadd [#allocation5], 4294967264  ;;  %v37_v0 = vlaneseq  ;;  %v36_v2 = vld [vmem:[%s243_s1] sm:$0x3]  ;;  %v181_v3 = vmov 0.0   ;;  %s182_s26 = smov 8  }
  0x13   :  { %vm45_vm1 = vcmp.gt.s32.totalorder %v36_v2, 0  ;;  %vm48_vm3 = vcmask 1047616   ;;  %s183_s0 = smov 121   ;;  %v34_v9 = vld [vmem:[#allocation4] sm:$0x3]  ;;  %vm68_vm5 = vcmask 58368  }
  0x14   :  { %v38_v1 = vshrl.u32 %v37_v0, 7  ;;  %v44_v10 = vand.u32 127, %v37_v0  ;;  %v64_v11 = vsub.f32 0.0, %v34_v9  ;;  %v35_v12 = vld [vmem:[%s244_s2] sm:$0x3]  ;;  %vm31_vm7 = vcmask 0  }
  0x15   :  { %32 = vst.msk [vmem:[#allocation2] sm:$0x1] %vm31_vm7, %v181_v3  ;;  %33 = vst.msk [vmem:[#allocation3] sm:$0x1] %vm31_vm7, %v181_v3  ;;  %s184_s29 = smov [#allocation7]  }
  0x16   :  { %vm42_vm0 = vcmp.lt.s32.totalorder %v38_v1, 2  ;;  %vm57_vm4 = vcmp.eq.s32.totalorder %v44_v10, 0  ;;  %v65_v14 = vmul.f32 %v64_v11, %v35_v12  ;;  %s111_s30 = sshll.u32 %s184_s29, 4  ;;  %s112_s30 = int_to_ptr.vmem [resolvable:$true] %s111_s30 }
  0x17   :  { %vm46_vm2 = vmand %vm42_vm0, %vm45_vm1  ;;  %v120_v13 = vsel %vm42_vm0, 1.0, %v181_v3  ;;  %s154_s4 = scalar_lea.vmem %s112_s30, 16  ;;  %s158_s5 = scalar_lea.vmem %s112_s30, 32 }
  0x18   :  { %v47_v4 = vsel %vm46_vm2, 1.0, %v181_v3  ;;  %p155_p8 = scmp.ne.s32.totalorder %s112_s30, %s154_s4  ;;  %p159_p9 = scmp.lt.s32.totalorder %s112_s30, %s112_s30 }
  0x19   :  { %49 = vrot.lane.b32.xlu0 %v47_v4, %s182_s26  ;;  %p160_p10 = scmp.lt.s32.totalorder %s158_s5, %s154_s4 }
  0x1b   :  { %p161_p11 = por %p160_p10, %p159_p9 }
  0x1c   :  { %v67_v34 = vld [vmem:[#allocation2] sm:$0x1]  ;;  %v83_v35 = vld [vmem:[#allocation3] sm:$0x1] }
  0x1d   :  { %p162_p12 = pnand %p161_p11, %p155_p8 }
  0x8b   :  { %v50_v5 = vpop.permute.xlu0 %49 }
  0x8c   :  { %v51_v6 = vsel %vm48_vm3, %v50_v5, %v47_v4 }
  0x8d   :  { %52 = vrot.lane.b32.xlu0 %v51_v6, %s182_s26 }
  0xff   :  { %v53_v7 = vpop.permute.xlu0 %52 }
 0x100   :  { %v54_v8 = vsel %vm48_vm3, %v53_v7, %v47_v4 }
 0x101   :  { %59 = vrot.lane.b32.xlu1 %v54_v8, %s183_s0 }
 0x173   :  { %v60_v15 = vpop.permute.xlu1 %59 }
 0x174   :  { %v62_v16 = vsel %vm57_vm4, %v120_v13, %v60_v15 }
 0x175   :  { %v84_v17 = vsel %vm68_vm5, %v62_v16, 0.0  ;;  %vm63_vm6 = vcmp.gt.f32.partialorder %v62_v16, 0.0 }
 0x176   :  { %85 = vadd.xlane.f32.xlu0 %v84_v17  ;;  %v66_v18 = vsel %vm63_vm6, %v65_v14, 0.0 }
 0x177   :  { %v69_v19 = vsel %vm68_vm5, %v66_v18, 0.0 }
 0x178   :  { %70 = vadd.xlane.f32.xlu1 %v69_v19 }
 0x203   :  { %v86_v20 = vpop.xlane.xlu0 %85 }
 0x204   :  { %v87_v21 = vrot.slane %v86_v20, 4 }
 0x205   :  { %v71_v22 = vpop.xlane.xlu1 %70 }
 0x206   :  { %v88_v23 = vadd.f32 %v87_v21, %v86_v20  ;;  %v72_v24 = vrot.slane %v71_v22, 4 }
 0x208   :  { %v89_v25 = vrot.slane %v88_v23, 2  ;;  %v73_v26 = vadd.f32 %v72_v24, %v71_v22 }
 0x20a   :  { %v90_v27 = vadd.f32 %v89_v25, %v88_v23  ;;  %v74_v28 = vrot.slane %v73_v26, 2 }
 0x20c   :  { %v75_v29 = vadd.f32 %v74_v28, %v73_v26  ;;  %v91_v30 = vrot.slane %v90_v27, 1 }
 0x20e   :  { %v76_v31 = vrot.slane %v75_v29, 1  ;;  %v92_v33 = vadd.f32 %v91_v30, %v90_v27 }
 0x210   :  { %v77_v32 = vadd.f32 %v76_v31, %v75_v29 }
 0x212   :  { %121 = vpush %v77_v32 }
 0x213   :  { %123 = vpush %v92_v33 }
 0x243   :  { %s122_s2 = spop %121 }
 0x244   :  { %v79_v36 = vstv %s122_s2  ;;  %s124_s28 = spop %123 }
 0x245   :  { %v80_v37 = vadd.f32 %v79_v36, %v67_v34  ;;  %v94_v38 = vstv %s124_s28 }
 0x246   :  { %v95_v39 = vadd.f32 %v94_v38, %v83_v35 }
 0x247   :  { %82 = vst.msk [vmem:[#allocation2] sm:$0x1] %vm31_vm7, %v80_v37 }
 0x248   :  { %96 = vst.msk [vmem:[#allocation3] sm:$0x1] %vm31_vm7, %v95_v39 }
 0x24e   :  { %v100_v42 = vld [vmem:[#allocation2] sm:$0x1] }
 0x24f   :  { %v101_v40 = vld [vmem:[#allocation3] sm:$0x1] }
 0x250   :  { %130 = vrcp.f32 %v101_v40 }
 0x25a   :  { %v131_v41 = vpop.eup %130 }
 0x25b   :  { %v103_v43 = vmul.f32 %v131_v41, %v100_v42 }
 0x25d   :  { %104 = vst.msk [vmem:[#allocation7] sm:$0x1] %vm31_vm7, %v103_v43 }
 0x25e   :  { %165 = shalt.err (!%p162_p12)
}
 0x25f   :  { %s166_s8 = scalar_lea.hbm %s245_s3, 16 }
 0x260   :  { %p167_p13 = scmp.ne.s32.totalorder %s245_s3, %s166_s8  ;;  %p170_p0 = scmp.lt.u32.totalorder %s166_s8, %s245_s3 }
 0x262   :  { %p172_p1 = pnand %p170_p0, %p167_p13 }
 0x264   :  { %175 = shalt.err (!%p172_p1)
}
 0x265   :  { %114 = dma.vmem_to_hbm [thread:$0]  %s112_s30, 16, %s245_s3, [#allocation6]  }
 0x266   :  { %178 = dma.done.wait [#allocation6], 16  }
 0x267   :  { %179 = vsyncadd [#allocation6], 4294967280 }
 0x268   :  { %118 = vsyncpa [#allocation5], 1 }
 0x269   :  { %119 = vsyncpa [#allocation6], 1 }

</bundles_post_ra>
